<compile_context>
chip_gen: v7x
topology: tpu7x:2x2x1
jax: 0.10.0
libtpu: 0.0.40
codegen_flags: <defaults>
</compile_context>

<pallas_src>
import jax
import jax.numpy as jnp
from jax.experimental import pallas as pl
from jax.experimental.pallas import tpu as pltpu

_LANE = 128
_BLOCK_BYTES = 4 * 1024 * 1024      # ~4 MiB per block; double-buffered in+out ~= 16 MiB
_VMEM_LIMIT = 48 * 1024 * 1024      # headroom on v7x's 64 MiB; fine on v5e/v6e


def _softmax_kernel(x_ref, o_ref):
    # Block: (Nb, C, TL).  Softmax over axis=1 (the channel axis C).
    x = x_ref[...].astype(jnp.float32)
    m = jnp.max(x, axis=1, keepdims=True)        # (Nb, 1, TL) cross-sublane reduce
    e = jnp.exp(x - m)                           # EUP; stable => sum >= 1
    s = jnp.sum(e, axis=1, keepdims=True)        # (Nb, 1, TL)
    inv = 1.0 / s                                # hoisted: one divide per column, not per element
    o_ref[...] = (e * inv).astype(o_ref.dtype)


def _tile_params(N, C, M, dtype_bytes):
    """Pick (Nb, TL) block dims and the grid from a VMEM byte budget."""
    if M < _LANE:
        # Full (unaligned) extent is allowed when it equals the array dim.
        tl = M
    else:
        max_tl = (M // _LANE) * _LANE                                  # largest 128-multiple <= M
        budget_tl = max(_LANE, (_BLOCK_BYTES // (C * dtype_bytes)) // _LANE * _LANE)
        tl = min(max_tl, budget_tl)
    grid_m = pl.cdiv(M, tl)

    # Grow the batch tile so each grid step still moves ~_BLOCK_BYTES when the
    # spatial extent is small, but keep >= 2 grid steps when possible (v7x).
    nb = min(N, max(1, _BLOCK_BYTES // max(1, C * tl * dtype_bytes)))
    if grid_m == 1 and N >= 2:
        nb = min(nb, (N + 1) // 2)
    grid_n = pl.cdiv(N, nb)
    return nb, tl, grid_n, grid_m


def softmax_forward(x):
    """Softmax over dim=1 of x (any rank >= 2), matching nn.Softmax(dim=1)."""
    orig_shape = x.shape
    N, C = orig_shape[0], orig_shape[1]
    M = 1
    for d in orig_shape[2:]:
        M *= d
    M = max(M, 1)

    x3 = x.reshape(N, C, M)
    dtype_bytes = jnp.dtype(x.dtype).itemsize
    nb, tl, grid_n, grid_m = _tile_params(N, C, M, dtype_bytes)

    total = N * C * M
    cost = pl.CostEstimate(
        flops=3 * total,
        transcendentals=total,
        bytes_accessed=2 * total * dtype_bytes,
    )

    out = pl.pallas_call(
        _softmax_kernel,
        out_shape=jax.ShapeDtypeStruct((N, C, M), x.dtype),
        grid_spec=pltpu.PrefetchScalarGridSpec(
            num_scalar_prefetch=0,
            grid=(grid_n, grid_m),
            in_specs=[pl.BlockSpec((nb, C, tl), lambda n, j: (n, 0, j))],
            out_specs=pl.BlockSpec((nb, C, tl), lambda n, j: (n, 0, j)),
        ),
        compiler_params=pltpu.CompilerParams(
            dimension_semantics=("parallel", "parallel"),
            vmem_limit_bytes=_VMEM_LIMIT,
        ),
        cost_estimate=cost,
    )(x3)

    return out.reshape(orig_shape)


def _reference(x):
    return jax.nn.softmax(x, axis=1)


if __name__ == "__main__":
    # Shapes consistent with the module: softmax over dim=1 of an NCHW tensor.
    N, C, H, W = 2, 4, 16, 16
    key = jax.random.PRNGKey(0)
    x = jax.random.normal(key, (N, C, H, W), dtype=jnp.float32)

    out = jax.block_until_ready(softmax_forward(x))
    ref = _reference(x)

    assert out.shape == x.shape, out.shape
    assert jnp.allclose(out, ref, atol=1e-6, rtol=1e-6), \
        float(jnp.max(jnp.abs(out - ref)))
    # Rows sum to 1 along dim=1.
    assert jnp.allclose(jnp.sum(out, axis=1), 1.0, atol=1e-5)

    print("KERNEL_OK")
</pallas_src>

<mosaic_0001>
module attributes {stable_mosaic.version = 11 : i64} {
  func.func @_softmax_kernel(%arg0: i32, %arg1: i32, %arg2: memref<1x4x256xf32, #tpu.memory_space<vmem>>, %arg3: memref<1x4x256xf32, #tpu.memory_space<vmem>>) attributes {dimension_semantics = [#tpu.dimension_semantics<parallel>, #tpu.dimension_semantics<parallel>], iteration_bounds = array<i64: 2, 1>, scalar_prefetch = 0 : i64, scratch_operands = 0 : i64, tpu.core_type = #tpu.core_type<tc>, window_params = [{transform_indices = @transform_0, window_bounds = array<i64: 1, 4, 256>}, {transform_indices = @transform_1, window_bounds = array<i64: 1, 4, 256>}]} {
    %c0 = arith.constant 0 : index
    %c0_0 = arith.constant 0 : index
    %c0_1 = arith.constant 0 : index
    %0 = vector.load %arg2[%c0, %c0_0, %c0_1] : memref<1x4x256xf32, #tpu.memory_space<vmem>>, vector<1x4x256xf32>
    %cst = arith.constant dense<0xFF800000> : vector<1x256xf32>
    %1 = vector.multi_reduction <maximumf>, %0, %cst [1] : vector<1x4x256xf32> to vector<1x256xf32>
    %2 = vector.shape_cast %1 : vector<1x256xf32> to vector<1x1x256xf32>
    %3 = vector.broadcast %2 : vector<1x1x256xf32> to vector<1x4x256xf32>
    %4 = arith.subf %0, %3 : vector<1x4x256xf32>
    %5 = math.exp %4 : vector<1x4x256xf32>
    %cst_2 = arith.constant dense<0.000000e+00> : vector<1x256xf32>
    %6 = vector.multi_reduction <add>, %5, %cst_2 [1] : vector<1x4x256xf32> to vector<1x256xf32>
    %7 = vector.shape_cast %6 : vector<1x256xf32> to vector<1x1x256xf32>
    %cst_3 = arith.constant 1.000000e+00 : f32
    %8 = vector.broadcast %cst_3 : f32 to vector<1x1x256xf32>
    %9 = arith.divf %8, %7 : vector<1x1x256xf32>
    %10 = vector.broadcast %9 : vector<1x1x256xf32> to vector<1x4x256xf32>
    %11 = arith.mulf %5, %10 : vector<1x4x256xf32>
    %c0_4 = arith.constant 0 : index
    %c0_5 = arith.constant 0 : index
    %c0_6 = arith.constant 0 : index
    %12 = vector.load %arg3[%c0_4, %c0_5, %c0_6] : memref<1x4x256xf32, #tpu.memory_space<vmem>>, vector<1x4x256xf32>
    tpu.vector_store %arg3[%c0_4, %c0_5, %c0_6], %11 {strides = array<i32>} : memref<1x4x256xf32, #tpu.memory_space<vmem>>, vector<1x4x256xf32>,
    return
  }
  func.func @transform_0(%arg0: i32, %arg1: i32) -> (i32, i32, i32) {
    %c0_i32 = arith.constant 0 : i32
    %c0_i32_0 = arith.constant 0 : i32
    return %arg0, %c0_i32, %arg1 : i32, i32, i32
  }
  func.func @transform_1(%arg0: i32, %arg1: i32) -> (i32, i32, i32) {
    %c0_i32 = arith.constant 0 : i32
    %c0_i32_0 = arith.constant 0 : i32
    return %arg0, %c0_i32, %arg1 : i32, i32, i32
  }
}

</mosaic_0001>

<bundles_post_ra>
// kernel: tpu_custom_call.1
= control target key start
LH: loop header
LB: loop body
LE: loop exit
PB: predicated region body
PF: predicated region fallthrough
CT: control target
= control target key end

     0   :  { %6 = vsyncpa [#allocation3], 0  ;;  %s699_s0 = inlined_call_operand.hbm [shape: f32[2,4,256], index: 0, kind: input, shape index: {}]   ;;  %s700_s1 = inlined_call_operand.hbm [shape: f32[2,4,256], index: 1, kind: output, shape index: {}]  }
   0x1   :  { %8 = vsyncpa [#allocation3 + $0x1], 0 }
   0x2   :  { %9 = vsyncpa [#allocation4], 0 }
   0x3   :  { %11 = vsyncpa [#allocation4 + $0x1], 0  ;;  %s519_s6 = smov 0   ;;  %s521_s7 = smov 0  }
   0x4   :  { %s523_s8 = smov 0   ;;  %s525_s9 = smov 0  }
   0x5   :  { %s527_s10 = smov 0   ;;  %s529_s11 = smov 0  }
   0x6 LB: > { %s307_s12 = sadd.s32 4294967295, %s505_s11   ;;  %s308_s13 = sadd.s32 4294967294, %s505_s11   ;;  %s505_s11 = sphi %s529_s11, %s17_s11   ;;  %s501_s10 = sphi %s527_s10, %s716_s10   ;;  %s497_s9 = sphi %s525_s9, %s715_s9   ;;  %s493_s8 = sphi %s523_s8, %s714_s8   ;;  %s489_s7 = sphi %s521_s7, %s713_s7   ;;  %s485_s6 = sphi %s519_s6, %s712_s6  }
   0x7   : > { %s29_s14 = sadd.s32 1, %s501_s10  ;;  %s38_s15 = sadd.s32 1, %s493_s8 }
   0x8   : > { %p31_p0 = scmp.ge.s32.totalorder %s29_s14, 2  ;;  %p45_p1 = scmp.ne.s32.totalorder %s493_s8, %s489_s7 }
   0x9   : > { %p46_p2 = scmp.eq.s32.totalorder %s505_s11, 0  ;;  %p51_p3 = scmp.ne.s32.totalorder %s489_s7, %s485_s6 }
   0xa   : > { %s718_s14 = smov (%p31_p0, %s29_s14), 0  ;;  %p52_p5 = scmp.eq.s32.totalorder %s307_s12, 0 }
   0xb   : > { %p560_p4 = por %p46_p2, %p45_p1  ;;  %s33_s17 = ssub.s32 %s501_s10, %s718_s14 }
   0xc   : > { %p77_p6 = scmp.eq.s32.totalorder %s307_s12, 1  ;;  %p36_p7 = scmp.eq.s32.totalorder %s33_s17, 0 }
   0xd   : > { %p566_p8 = por %p52_p5, %p51_p3  ;;  %p83_p10 = scmp.eq.s32.totalorder %s308_s13, 1 }
   0xe   : > { %p570_p9 = por %p77_p6, %p45_p1  ;;  %p336_p13 = scmp.lt.s32.totalorder %s505_s11, 2 }
   0xf   : > { %s575_s20 = scalar_select %p36_p7, %s493_s8, %s38_s15  }
  0x10   : > { %s704_s19 = scalar_select %p570_p9, 1, 0 }
  0x11   : > { %p577_p11 = por %p83_p10, %p51_p3  ;;  %s103_s22 = sand.u32 1, %s493_s8  }
  0x12   : > { %s311_s23 = sshll.u32 %s103_s22, 3  ;;  %s322_s24 = sshll.u32 %s501_s10, 7 }
  0x13   : > { %s705_s21 = scalar_select %p577_p11, 1, 0 }
  0x14   : > { %s588_s27 = scalar_lea.hbm %s699_s0, %s322_s24  ;;  %s107_s28 = scalar_lea.vmem [#allocation2], %s311_s23 }
  0x15   : > { %s117_s29 = sshll.u32 %s107_s28, 4  ;;  %p594_p0 = pnand %p336_p13, %p560_p4  ;;  %s590_s29 = int_to_ptr.vmem [resolvable:$true] %s117_s29 }
  0x16   : > { %s104_s2 = scalar_lea.sflag [#allocation3], %s103_s22  ;;  %s393_s3 = scalar_lea.hbm %s588_s27, 128 }
  0x17   : > { %p394_p3 = scmp.ne.s32.totalorder %s588_s27, %s393_s3  ;;  %p395_p5 = pneg %p594_p0 }
  0x18   : > { %s398_s12 = scalar_lea.hbm %s699_s0, 256  ;;  %p399_p4 = scmp.lt.u32.totalorder %s588_s27, %s699_s0 }
  0x19   : > { %p396_p6 = pnand %p395_p5, %p394_p3  ;;  %p400_p10 = scmp.lt.u32.totalorder %s398_s12, %s393_s3 }
  0x1a   : > { %p402_p12 = scmp.lt.u32.totalorder %s393_s3, %s588_s27 }
  0x1b   : > { %p397_p7 = pneg %p396_p6  ;;  %p401_p13 = por %p400_p10, %p399_p4 }
  0x1d   : > { %p403_p1 = por %p402_p12, %p401_p13 }
  0x1f   : > { %p404_p2 = pnand %p403_p1, %p397_p7 }
  0x21   : > { %407 = shalt.err (!%p404_p2)
}
  0x22   : > { %s408_s16 = scalar_lea.vmem %s590_s29, 128  ;;  %s507_s17 = smov [#allocation2]  }
  0x23   : > { %p409_p3 = scmp.ne.s32.totalorder %s590_s29, %s408_s16  ;;  %s413_s22 = sshll.u32 %s507_s17, 4  ;;  %s414_s22 = int_to_ptr.vmem [resolvable:$false] %s413_s22 }
  0x24   : > { %s415_s23 = scalar_lea.vmem %s414_s22, 256  ;;  %p416_p9 = scmp.lt.s32.totalorder %s590_s29, %s414_s22 }
  0x25   : > { %p411_p6 = pnand %p409_p3, %p395_p5  ;;  %p417_p4 = scmp.lt.s32.totalorder %s415_s23, %s408_s16 }
  0x27   : > { %p412_p11 = pneg %p411_p6  ;;  %p418_p10 = por %p417_p4, %p416_p9 }
  0x29   : > { %p419_p12 = pnand %p418_p10, %p412_p11 }
  0x2b   : > { %422 = shalt.err (!%p419_p12)
}
  0x2c   : > { %331 = dma.hbm_to_vmem [thread:$0]  (!%p594_p0), %s588_s27, 128, %s590_s29, %s104_s2  }
  0x2d   : > { %p707_p1 = scmp.lt.s32.totalorder %s505_s11, 3  ;;  %p708_p2 = scmp.ge.s32.totalorder %s505_s11, 1 }
  0x2f   : > { %p123_p5 = pnand %p708_p2, %p707_p1 }
  0x30   : > { %s630_s24 = sand.u32 (!%p123_p5), 1, %s489_s7  }
  0x31   : > { %126 = sbr.rel (%p123_p5) target bundleno = 134 (0x86), region = 24  ;;  %s315_s25 = sshll.u32 (!%p123_p5), %s630_s24, 3 }
  0x32   : > { %s129_s26 = scalar_lea.sflag (!%p123_p5), [#allocation3], %s630_s24  ;;  %s132_s28 = scalar_lea.vmem (!%p123_p5), [#allocation2], %s315_s25 }
  0x38   : > { %476 = dma.done.wait (%p566_p8), %s129_s26, 128  }
  0x39   : > { %478 = vsyncadd (%p566_p8), %s129_s26, 4294967168  ;;  %vm157_vm0 = vcmask 1043456   ;;  %v153_v0 = vld [vmem:[%s132_s28] sm:$0xff]  ;;  %s150_s18 = scalar_lea.vmem [#allocation5], %s315_s25  ;;  %s323_s29 = sshll.u32 %s497_s9, 7 }
  0x3a   : > { %v155_v1 = vcombine.high %v153_v0, %v153_v0  ;;  %v158_v2 = vsel %vm157_vm0, %v153_v0, -inf  ;;  %s223_s27 = sshll.u32 %s150_s18, 4  ;;  %s652_s3 = scalar_lea.hbm %s700_s1, %s323_s29  ;;  %s647_s27 = int_to_ptr.vmem [resolvable:$true] %s223_s27 }
  0x3b   : > { %v159_v3 = vrot.slane %v158_v2, 4  ;;  %s207_s4 = scalar_lea.sflag [#allocation4], %s630_s24  ;;  %s423_s5 = scalar_lea.vmem %s647_s27, 128 }
  0x3c   : > { %v165_v4 = vsel %vm157_vm0, %v155_v1, -inf  ;;  %p424_p8 = scmp.ne.s32.totalorder %s647_s27, %s423_s5  ;;  %p709_p9 = scmp.ne.s32.totalorder %s704_s19, 0 }
  0x3d   : > { %v160_v5 = vmax.f32 %v158_v2, %v159_v3  ;;  %v166_v6 = vrot.slane %v165_v4, 4  ;;  %s508_s9 = smov [#allocation5]  }
  0x3e   : > { %p425_p11 = pnand %p424_p8, %p709_p9  ;;  %s427_s12 = sshll.u32 %s508_s9, 4  ;;  %s428_s12 = int_to_ptr.vmem [resolvable:$false] %s427_s12 }
  0x3f   : > { %v161_v7 = vrot.slane %v160_v5, 2  ;;  %v167_v8 = vmax.f32 %v165_v4, %v166_v6  ;;  %s429_s13 = scalar_lea.vmem %s428_s12, 256  ;;  %p430_p7 = scmp.lt.s32.totalorder %s647_s27, %s428_s12 }
  0x40   : > { %p426_p0 = pneg %p425_p11  ;;  %p431_p13 = scmp.lt.s32.totalorder %s429_s13, %s423_s5 }
  0x41   : > { %v162_v9 = vmax.f32 %v160_v5, %v161_v7  ;;  %v168_v10 = vrot.slane %v167_v8, 2 }
  0x42   : > { %p432_p3 = por %p431_p13, %p430_p7 }
  0x43   : > { %v163_v11 = vrot.slane %v162_v9, 1  ;;  %v169_v12 = vmax.f32 %v167_v8, %v168_v10 }
  0x44   : > { %p433_p6 = pnand %p432_p3, %p426_p0 }
  0x45   : > { %v164_v13 = vmax.f32 %v162_v9, %v163_v11  ;;  %v170_v14 = vrot.slane %v169_v12, 1 }
  0x47   : > { %v171_v15 = vmax.f32 %v169_v12, %v170_v14 }
  0x49   : > { %v174_v16 = vcombine.low %v164_v13, %v171_v15 }
  0x4b   : > { %v176_v17 = vsub.f32 %v153_v0, %v174_v16 }
  0x4d   : > { %v177_v18 = vmul.f32 1.442695, %v176_v17 }
  0x4f   : > { %387 = vpow2.f32 %v177_v18 }
  0x59   : > { %v388_v19 = vpop.eup %387 }
  0x5a   : > { %v180_v20 = vcombine.high %v388_v19, %v388_v19  ;;  %v182_v21 = vsel %vm157_vm0, %v388_v19, 0.0 }
  0x5b   : > { %v183_v22 = vrot.slane %v182_v21, 4 }
  0x5c   : > { %v189_v23 = vsel %vm157_vm0, %v180_v20, 0.0 }
  0x5d   : > { %v184_v24 = vadd.f32 %v183_v22, %v182_v21  ;;  %v190_v25 = vrot.slane %v189_v23, 4 }
  0x5f   : > { %v185_v26 = vrot.slane %v184_v24, 2  ;;  %v191_v27 = vadd.f32 %v190_v25, %v189_v23 }
  0x61   : > { %v186_v28 = vadd.f32 %v185_v26, %v184_v24  ;;  %v192_v29 = vrot.slane %v191_v27, 2 }
  0x63   : > { %v187_v30 = vrot.slane %v186_v28, 1  ;;  %v193_v31 = vadd.f32 %v192_v29, %v191_v27 }
  0x65   : > { %v188_v32 = vadd.f32 %v187_v30, %v186_v28  ;;  %v194_v33 = vrot.slane %v193_v31, 1 }
  0x67   : > { %v195_v34 = vadd.f32 %v194_v33, %v193_v31  ;;  %389 = vrcp.f32 %v188_v32 }
  0x69   : > { %391 = vrcp.f32 %v195_v34 }
  0x71   : > { %v390_v35 = vpop.eup %389 }
  0x73   : > { %v392_v36 = vpop.eup %391 }
  0x74   : > { %v202_v37 = vcombine.low %v390_v35, %v392_v36 }
  0x76   : > { %v204_v38 = vmul.f32 %v388_v19, %v202_v37 }
  0x78   : > { %205 = vst [vmem:[%s150_s18] sm:$0xff] %v204_v38 }
  0x79   : > { %436 = shalt.err (!%p433_p6)
}
  0x7a   : > { %s437_s15 = scalar_lea.hbm %s652_s3, 128  ;;  %s441_s22 = scalar_lea.hbm %s700_s1, 256 }
  0x7b   : > { %p438_p4 = scmp.ne.s32.totalorder %s652_s3, %s437_s15  ;;  %p442_p1 = scmp.lt.u32.totalorder %s652_s3, %s700_s1 }
  0x7c   : > { %p443_p2 = scmp.lt.u32.totalorder %s441_s22, %s437_s15  ;;  %p445_p8 = scmp.lt.u32.totalorder %s437_s15, %s652_s3 }
  0x7d   : > { %p439_p10 = pnand %p438_p4, %p709_p9 }
  0x7e   : > { %p444_p5 = por %p443_p2, %p442_p1 }
  0x7f   : > { %p440_p12 = pneg %p439_p10 }
  0x80   : > { %p446_p11 = por %p445_p8, %p444_p5 }
  0x82   : > { %p447_p0 = pnand %p446_p11, %p440_p12 }
  0x84   : > { %450 = shalt.err (!%p447_p0)
}
  0x85   : > { %326 = dma.vmem_to_hbm [thread:$0]  (%p709_p9), %s647_s27, 128, %s652_s3, %s207_s4  }
  0x86 PF: > { %s235_s25 = sand.u32 1, %s485_s6   ;;  %p710_p7 = scmp.ne.s32.totalorder %s705_s21, 0 }
  0x87   : > { %p711_p13 = scmp.ge.s32.totalorder %s505_s11, 2  ;;  %s236_s26 = scalar_lea.sflag [#allocation4], %s235_s25 }
  0x89   : > { %p333_p3 = pnand %p711_p13, %p710_p7 }
  0x8b   : > { %480 = dma.done.wait (!%p333_p3), %s236_s26, 128  }
  0x8c   : > { %482 = vsyncadd (!%p333_p3), %s236_s26, 4294967168  ;;  %s17_s11 = sadd.s32 1, %s505_s11   ;;  %s712_s6 = smov %s489_s7 }
  0x8d   : > { %p14_p6 = scmp.ge.s32.totalorder %s17_s11, 4   ;;  %s713_s7 = smov %s493_s8 }
  0x8e   : > { %s714_s8 = smov %s575_s20  ;;  %s715_s9 = smov %s501_s10 }
  0x8f   : > { %s716_s10 = smov %s718_s14  ;;  %16 = sbr.rel (!%p14_p6) target bundleno = 6 (0x6), region = 69 }
  0x96   :  { %241 = vsyncpa [#allocation3], 1 }
  0x97   :  { %243 = vsyncpa [#allocation3 + $0x1], 1 }
  0x98   :  { %244 = vsyncpa [#allocation4], 1 }
  0x99   :  { %246 = vsyncpa [#allocation4 + $0x1], 1 }

</bundles_post_ra>
